<compile_context>
chip_gen: v5e
topology: v5e:2x2
jax: 0.10.0
libtpu: 0.0.40
codegen_flags: <defaults>
</compile_context>

<pallas_src>
import functools

import jax
import jax.numpy as jnp
from jax.experimental import pallas as pl
from jax.experimental.pallas import tpu as pltpu


def _focal_loss_kernel(alpha_s_ref, x_ref, y_ref, *rest, gamma, ignore_index,
                       n_cols, tile_n, tiles_per_split, need_mask,
                       unroll_alpha, exp_in_bf16):
    if unroll_alpha:
        loss_ref, cnt_ref = rest
        alpha_v_ref = None
    else:
        alpha_v_ref, loss_ref, cnt_ref = rest

    j = pl.program_id(2)

    # Zero the per-(batch, split) accumulators at the start of the spatial loop.
    @pl.when(j == 0)
    def _():
        loss_ref[...] = jnp.zeros_like(loss_ref)
        cnt_ref[...] = jnp.zeros_like(cnt_ref)

    x = x_ref[0].astype(jnp.float32)        # (C, TN) logits: classes on sublanes
    y = y_ref[0].astype(jnp.int32)          # (1, TN) int32 labels
    c, tn = x.shape

    # log-softmax pieces along the class (sublane) axis, independently per lane.
    m = jnp.max(x, axis=0, keepdims=True)                        # (1, TN)
    if exp_in_bf16:
        # v6e/v7x only (EUP bf16 path); small accuracy cost in lse.
        p_all = jnp.exp((x - m).astype(jnp.bfloat16)).astype(jnp.float32)
    else:
        p_all = jnp.exp(x - m)
    s = jnp.sum(p_all, axis=0, keepdims=True)                    # (1, TN)
    lse = jnp.log(s)

    # Gather x[y] with a one-hot select over the class axis (gather from x, not
    # z, so the shifted logits are not kept live for the gather).
    cls = jax.lax.broadcasted_iota(jnp.int32, (c, tn), 0)
    onehot = cls == y                                            # (C, TN)
    x_y = jnp.sum(jnp.where(onehot, x, 0.0), axis=0, keepdims=True)  # (1, TN)
    log_pt = (x_y - m) - lse

    # Gather alpha[y].
    if unroll_alpha:
        # C-way unrolled scalar select from SMEM: VPU only — no 4th cross-
        # sublane reduction and no (C, TN) alpha broadcast.
        a_y = jnp.zeros((1, tn), jnp.float32)
        for cc in range(c):
            a_y = jnp.where(y == cc, alpha_s_ref[cc], a_y)
    else:
        a_y = jnp.sum(jnp.where(onehot, alpha_v_ref[...], 0.0),
                      axis=0, keepdims=True)

    ce = -(a_y * log_pt)                    # weighted NLL, reduction='none'

    # Focal term specialized on the static gamma.
    if gamma == 0.0:
        f_ce = ce
    else:
        pt = jnp.exp(log_pt)
        base = jnp.maximum(1.0 - pt, 0.0)   # exp(log_pt) may round slightly > 1
        if float(gamma).is_integer() and 0 < gamma <= 8:
            focal = base
            for _ in range(int(gamma) - 1):
                focal = focal * base
        else:
            focal = base ** gamma
        f_ce = focal * ce

    valid = y != ignore_index
    if need_mask:
        # Mask the ragged last tile (inputs are not padded; the OOB region of
        # the block holds unspecified data that must never be accumulated).
        col = ((pl.program_id(1) * tiles_per_split + j) * tile_n
               + jax.lax.broadcasted_iota(jnp.int32, (1, tn), 1))
        valid = valid & (col < n_cols)

    # Lane-dense element-wise accumulation; the tiny final reduce is in the wrapper.
    loss_ref[0] += jnp.where(valid, f_ce, 0.0)
    cnt_ref[0] += valid.astype(jnp.float32)


def focal_loss(x, y, alpha=None, gamma=0.0, reduction='mean',
               ignore_index=-100, target_block_bytes=4 << 20,
               exp_in_bf16=False):
    if reduction not in ('mean', 'sum', 'none'):
        raise ValueError('Reduction must be one of: "mean", "sum", "none".')
    if reduction == 'none':
        # TODO(synk): reduction='none' returns a per-unignored-row vector whose
        # length is data dependent in PyTorch; not expressible with static shapes.
        raise NotImplementedError("reduction='none' is not supported in the Pallas port")

    if x.ndim > 2:
        # NCHW-native: (B, C, d1..dK) -> (B, C, S) is a free row-major reshape
        # (no transpose / pad / upcast HBM passes).
        b, c = x.shape[0], x.shape[1]
        s = 1
        for d in x.shape[2:]:
            s *= d
        x3 = x.reshape(b, c, s)
        y3 = y.reshape(b, 1, s)
    else:
        # (N, C) case: classes must sit on sublanes, so one wrapper transpose.
        # TODO(synk): remove this extra HBM pass by transposing (tile_n, C)
        # blocks on-chip (XLU) for the 2-D path.
        n, c = x.shape
        b, s = 1, n
        x3 = x.T.reshape(1, c, n)
        y3 = y.reshape(1, 1, n)
    if y3.dtype != jnp.int32:
        y3 = y3.astype(jnp.int32)   # no-op pass when labels are already int32

    if alpha is None:
        alpha_vec = jnp.ones((c,), jnp.float32)
    else:
        alpha_vec = jnp.asarray(alpha, jnp.float32).reshape(c)

    itemsize = jnp.dtype(x3.dtype).itemsize
    s_pad = ((s + 127) // 128) * 128

    # Lane-tile sizing: target ~4 MiB logits blocks (multiple of 128 lanes).
    tile_n = max(128, (target_block_bytes // max(1, c * itemsize)) // 128 * 128)
    tile_n = min(tile_n, s_pad, 1 << 18)

    # Keep a generous per-step VMEM estimate under ~44 MiB so one tile policy
    # fits v7x (64 MiB physical) as well as v5e/v6e (128 MiB physical).
    def vmem_estimate(t):
        x_blk = c * t * itemsize            # raw logits block (double-buffered)
        xf_blk = c * t * 4                  # f32 copy / (C, TN) temporaries
        row = t * 4                         # one (1, TN) f32 row
        return 2 * x_blk + 2 * row + 4 * row + 3 * xf_blk + 12 * row

    while tile_n > 128 and vmem_estimate(tile_n) > (44 << 20):
        tile_n = max(128, (tile_n // 2 + 127) // 128 * 128)

    ntiles = pl.cdiv(s, tile_n)
    # If a single batch row would produce a single tile, split it so both of
    # v7x's TensorCores get work (harmless on single-core chips).
    if b == 1 and ntiles == 1 and s_pad >= 256:
        tile_n = (s_pad // 2 + 127) // 128 * 128
        ntiles = pl.cdiv(s, tile_n)
    n_split = 2 if (ntiles >= 2 and ntiles % 2 == 0) else 1
    tiles_per_split = ntiles // n_split
    need_mask = (s % tile_n) != 0

    vmem_limit = int(min(48 << 20, max(32 << 20, vmem_estimate(tile_n) + (4 << 20))))

    # Small/moderate class counts: unrolled SMEM select; huge C: one-hot + sum.
    unroll_alpha = c <= 64

    kernel = functools.partial(
        _focal_loss_kernel,
        gamma=float(gamma),
        ignore_index=int(ignore_index),
        n_cols=s,
        tile_n=tile_n,
        tiles_per_split=tiles_per_split,
        need_mask=need_mask,
        unroll_alpha=unroll_alpha,
        exp_in_bf16=bool(exp_in_bf16),
    )

    x_spec = pl.BlockSpec((1, c, tile_n),
                          lambda i, k, j, a_s: (i, 0, k * tiles_per_split + j))
    y_spec = pl.BlockSpec((1, 1, tile_n),
                          lambda i, k, j, a_s: (i, 0, k * tiles_per_split + j))
    out_spec = pl.BlockSpec((1, 1, tile_n),
                            lambda i, k, j, a_s: (i * n_split + k, 0, 0))

    in_specs = [x_spec, y_spec]
    args = [alpha_vec, x3, y3]
    if not unroll_alpha:
        in_specs.append(pl.BlockSpec((c, 1), lambda i, k, j, a_s: (0, 0)))
        args.append(alpha_vec.reshape(c, 1))

    loss_parts, cnt_parts = pl.pallas_call(
        kernel,
        out_shape=(jax.ShapeDtypeStruct((b * n_split, 1, tile_n), jnp.float32),
                   jax.ShapeDtypeStruct((b * n_split, 1, tile_n), jnp.float32)),
        grid_spec=pltpu.PrefetchScalarGridSpec(
            num_scalar_prefetch=1,                      # alpha -> SMEM
            grid=(b, n_split, tiles_per_split),
            in_specs=in_specs,
            out_specs=[out_spec, out_spec],
        ),
        compiler_params=pltpu.CompilerParams(
            dimension_semantics=("parallel", "parallel", "arbitrary"),
            vmem_limit_bytes=vmem_limit),
    )(*args)

    total = jnp.sum(loss_parts)
    count = jnp.sum(cnt_parts)
    if reduction == 'sum':
        return total
    # 'mean': matches the torch module, which returns 0.0 when every label is ignored.
    return jnp.where(count > 0, total / jnp.maximum(count, 1.0), jnp.float32(0.0))


if __name__ == "__main__":
    key = jax.random.PRNGKey(0)
    kx, ky, km, kx2, ky2, km2 = jax.random.split(key, 6)

    # --- 4-D (B, C, H, W) segmentation-style case ---
    B, C, H, W = 2, 4, 16, 16
    gamma = 2.0
    ignore_index = -100

    x = jax.random.normal(kx, (B, C, H, W), jnp.float32)            # NCHW logits
    y = jax.random.randint(ky, (B, H, W), 0, C, jnp.int32)          # labels
    y = jnp.where(jax.random.uniform(km, (B, H, W)) < 0.1, ignore_index, y)
    alpha = jnp.linspace(0.5, 1.5, C).astype(jnp.float32)

    out = focal_loss(x, y, alpha=alpha, gamma=gamma,
                     reduction='mean', ignore_index=ignore_index)
    jax.block_until_ready(out)

    # Pure-JAX reference (mirrors the PyTorch forward).
    xf = jnp.moveaxis(x, 1, -1).reshape(-1, C)
    yf = y.reshape(-1)
    mask = yf != ignore_index
    ysafe = jnp.clip(yf, 0, C - 1)
    log_p = jax.nn.log_softmax(xf, axis=-1)
    log_pt = jnp.take_along_axis(log_p, ysafe[:, None], axis=-1)[:, 0]
    ce = -alpha[ysafe] * log_pt
    loss = (1.0 - jnp.exp(log_pt)) ** gamma * ce
    ref = jnp.sum(jnp.where(mask, loss, 0.0)) / jnp.sum(mask)
    assert jnp.allclose(out, ref, rtol=1e-5, atol=1e-5), (out, ref)

    # --- 2-D (N, C) classification-style case (exercises the ragged tail mask) ---
    N = 100
    x2 = jax.random.normal(kx2, (N, C), jnp.float32)
    y2 = jax.random.randint(ky2, (N,), 0, C, jnp.int32)
    y2 = jnp.where(jax.random.uniform(km2, (N,)) < 0.1, ignore_index, y2)

    out2 = focal_loss(x2, y2, alpha=alpha, gamma=gamma,
                      reduction='sum', ignore_index=ignore_index)
    jax.block_until_ready(out2)

    mask2 = y2 != ignore_index
    ysafe2 = jnp.clip(y2, 0, C - 1)
    log_p2 = jax.nn.log_softmax(x2, axis=-1)
    log_pt2 = jnp.take_along_axis(log_p2, ysafe2[:, None], axis=-1)[:, 0]
    ce2 = -alpha[ysafe2] * log_pt2
    loss2 = (1.0 - jnp.exp(log_pt2)) ** gamma * ce2
    ref2 = jnp.sum(jnp.where(mask2, loss2, 0.0))
    assert jnp.allclose(out2, ref2, rtol=1e-5, atol=1e-5), (out2, ref2)

    print("KERNEL_OK")
</pallas_src>

<mosaic_0001>
module attributes {stable_mosaic.version = 11 : i64} {
  func.func @_focal_loss_kernel(%arg0: i32, %arg1: i32, %arg2: i32, %arg3: memref<4xf32, #tpu.memory_space<smem>>, %arg4: memref<1x4x256xf32, #tpu.memory_space<vmem>>, %arg5: memref<1x1x256xi32, #tpu.memory_space<vmem>>, %arg6: memref<1x1x256xf32, #tpu.memory_space<vmem>>, %arg7: memref<1x1x256xf32, #tpu.memory_space<vmem>>) attributes {dimension_semantics = [#tpu.dimension_semantics<parallel>, #tpu.dimension_semantics<parallel>, #tpu.dimension_semantics<arbitrary>], iteration_bounds = array<i64: 2, 1, 1>, scalar_prefetch = 1 : i64, scratch_operands = 0 : i64, tpu.core_type = #tpu.core_type<tc>, window_params = [{transform_indices = @transform_0, window_bounds = array<i64: 1, 4, 256>}, {transform_indices = @transform_1, window_bounds = array<i64: 1, 1, 256>}, {transform_indices = @transform_2, window_bounds = array<i64: 1, 1, 256>}, {transform_indices = @transform_3, window_bounds = array<i64: 1, 1, 256>}]} {
    %c0_i32 = arith.constant 0 : i32
    %0 = arith.cmpi eq, %arg2, %c0_i32 : i32
    %1 = arith.extui %0 : i1 to i32
    %c0_i32_0 = arith.constant 0 : i32
    %2 = arith.cmpi ne, %1, %c0_i32_0 : i32
    scf.if %2 {
      %cst_28 = arith.constant 0.000000e+00 : f32
      %73 = vector.broadcast %cst_28 : f32 to vector<1x1x256xf32>
      %c0_29 = arith.constant 0 : index
      %c0_30 = arith.constant 0 : index
      %c0_31 = arith.constant 0 : index
      %74 = vector.load %arg6[%c0_29, %c0_30, %c0_31] : memref<1x1x256xf32, #tpu.memory_space<vmem>>, vector<1x1x256xf32>
      tpu.vector_store %arg6[%c0_29, %c0_30, %c0_31], %73 {strides = array<i32>} : memref<1x1x256xf32, #tpu.memory_space<vmem>>, vector<1x1x256xf32>,
      %cst_32 = arith.constant 0.000000e+00 : f32
      %75 = vector.broadcast %cst_32 : f32 to vector<1x1x256xf32>
      %c0_33 = arith.constant 0 : index
      %c0_34 = arith.constant 0 : index
      %c0_35 = arith.constant 0 : index
      %76 = vector.load %arg7[%c0_33, %c0_34, %c0_35] : memref<1x1x256xf32, #tpu.memory_space<vmem>>, vector<1x1x256xf32>
      tpu.vector_store %arg7[%c0_33, %c0_34, %c0_35], %75 {strides = array<i32>} : memref<1x1x256xf32, #tpu.memory_space<vmem>>, vector<1x1x256xf32>,
    } else {
    }
    %c0 = arith.constant 0 : index
    %c0_1 = arith.constant 0 : index
    %c0_2 = arith.constant 0 : index
    %3 = vector.load %arg4[%c0, %c0_1, %c0_2] : memref<1x4x256xf32, #tpu.memory_space<vmem>>, vector<1x4x256xf32>
    %4 = vector.shape_cast %3 : vector<1x4x256xf32> to vector<4x256xf32>
    %c0_3 = arith.constant 0 : index
    %c0_4 = arith.constant 0 : index
    %c0_5 = arith.constant 0 : index
    %5 = vector.load %arg5[%c0_3, %c0_4, %c0_5] : memref<1x1x256xi32, #tpu.memory_space<vmem>>, vector<1x1x256xi32>
    %6 = vector.shape_cast %5 : vector<1x1x256xi32> to vector<1x256xi32>
    %cst = arith.constant dense<0xFF800000> : vector<256xf32>
    %7 = vector.multi_reduction <maximumf>, %4, %cst [0] : vector<4x256xf32> to vector<256xf32>
    %8 = vector.shape_cast %7 : vector<256xf32> to vector<1x256xf32>
    %9 = vector.broadcast %8 : vector<1x256xf32> to vector<4x256xf32>
    %10 = arith.subf %4, %9 : vector<4x256xf32>
    %11 = math.exp %10 : vector<4x256xf32>
    %cst_6 = arith.constant dense<0.000000e+00> : vector<256xf32>
    %12 = vector.multi_reduction <add>, %11, %cst_6 [0] : vector<4x256xf32> to vector<256xf32>
    %13 = vector.shape_cast %12 : vector<256xf32> to vector<1x256xf32>
    %14 = math.log %13 : vector<1x256xf32>
    %15 = tpu.iota {dimensions = array<i32: 0>} : vector<4x256xi32>
    %16 = vector.broadcast %6 : vector<1x256xi32> to vector<4x256xi32>
    %17 = arith.cmpi eq, %15, %16 : vector<4x256xi32>
    %cst_7 = arith.constant 0.000000e+00 : f32
    %18 = vector.broadcast %cst_7 : f32 to vector<4x256xf32>
    %19 = arith.select %17, %4, %18 : vector<4x256xi1>, vector<4x256xf32>
    %cst_8 = arith.constant dense<0.000000e+00> : vector<256xf32>
    %20 = vector.multi_reduction <add>, %19, %cst_8 [0] : vector<4x256xf32> to vector<256xf32>
    %21 = vector.shape_cast %20 : vector<256xf32> to vector<1x256xf32>
    %22 = arith.subf %21, %8 : vector<1x256xf32>
    %23 = arith.subf %22, %14 : vector<1x256xf32>
    %cst_9 = arith.constant 0.000000e+00 : f32
    %24 = vector.broadcast %cst_9 : f32 to vector<1x256xf32>
    %c0_i32_10 = arith.constant 0 : i32
    %25 = vector.broadcast %c0_i32_10 : i32 to vector<1x256xi32>
    %26 = arith.cmpi eq, %6, %25 : vector<1x256xi32>
    %c0_11 = arith.constant 0 : index
    %27 = memref.load %arg3[%c0_11] : memref<4xf32, #tpu.memory_space<smem>>
    %28 = vector.broadcast %27 : f32 to vector<1x256xf32>
    %29 = arith.select %26, %28, %24 : vector<1x256xi1>, vector<1x256xf32>
    %c1_i32 = arith.constant 1 : i32
    %30 = vector.broadcast %c1_i32 : i32 to vector<1x256xi32>
    %31 = arith.cmpi eq, %6, %30 : vector<1x256xi32>
    %c1 = arith.constant 1 : index
    %32 = memref.load %arg3[%c1] : memref<4xf32, #tpu.memory_space<smem>>
    %33 = vector.broadcast %32 : f32 to vector<1x256xf32>
    %34 = arith.select %31, %33, %29 : vector<1x256xi1>, vector<1x256xf32>
    %c2_i32 = arith.constant 2 : i32
    %35 = vector.broadcast %c2_i32 : i32 to vector<1x256xi32>
    %36 = arith.cmpi eq, %6, %35 : vector<1x256xi32>
    %c2 = arith.constant 2 : index
    %37 = memref.load %arg3[%c2] : memref<4xf32, #tpu.memory_space<smem>>
    %38 = vector.broadcast %37 : f32 to vector<1x256xf32>
    %39 = arith.select %36, %38, %34 : vector<1x256xi1>, vector<1x256xf32>
    %c3_i32 = arith.constant 3 : i32
    %40 = vector.broadcast %c3_i32 : i32 to vector<1x256xi32>
    %41 = arith.cmpi eq, %6, %40 : vector<1x256xi32>
    %c3 = arith.constant 3 : index
    %42 = memref.load %arg3[%c3] : memref<4xf32, #tpu.memory_space<smem>>
    %43 = vector.broadcast %42 : f32 to vector<1x256xf32>
    %44 = arith.select %41, %43, %39 : vector<1x256xi1>, vector<1x256xf32>
    %45 = arith.mulf %44, %23 : vector<1x256xf32>
    %cst_12 = arith.constant 0.000000e+00 : f32
    %46 = vector.broadcast %cst_12 : f32 to vector<1x256xf32>
    %47 = arith.subf %46, %45 : vector<1x256xf32>
    %48 = math.exp %23 : vector<1x256xf32>
    %cst_13 = arith.constant 1.000000e+00 : f32
    %49 = vector.broadcast %cst_13 : f32 to vector<1x256xf32>
    %50 = arith.subf %49, %48 : vector<1x256xf32>
    %cst_14 = arith.constant 0.000000e+00 : f32
    %51 = vector.broadcast %cst_14 : f32 to vector<1x256xf32>
    %52 = arith.maximumf %50, %51 : vector<1x256xf32>
    %53 = arith.mulf %52, %52 : vector<1x256xf32>
    %54 = arith.mulf %53, %47 : vector<1x256xf32>
    %c-100_i32 = arith.constant -100 : i32
    %55 = vector.broadcast %c-100_i32 : i32 to vector<1x256xi32>
    %56 = arith.cmpi ne, %6, %55 : vector<1x256xi32>
    %c0_15 = arith.constant 0 : index
    %c0_16 = arith.constant 0 : index
    %c0_17 = arith.constant 0 : index
    %57 = vector.load %arg6[%c0_15, %c0_16, %c0_17] : memref<1x1x256xf32, #tpu.memory_space<vmem>>, vector<1x1x256xf32>
    %58 = vector.shape_cast %57 : vector<1x1x256xf32> to vector<1x256xf32>
    %cst_18 = arith.constant 0.000000e+00 : f32
    %59 = vector.broadcast %cst_18 : f32 to vector<1x256xf32>
    %60 = arith.select %56, %54, %59 : vector<1x256xi1>, vector<1x256xf32>
    %61 = arith.addf %58, %60 : vector<1x256xf32>
    %c0_19 = arith.constant 0 : index
    %c0_20 = arith.constant 0 : index
    %c0_21 = arith.constant 0 : index
    %62 = vector.load %arg6[%c0_19, %c0_20, %c0_21] : memref<1x1x256xf32, #tpu.memory_space<vmem>>, vector<1x1x256xf32>
    %63 = vector.shape_cast %62 : vector<1x1x256xf32> to vector<1x256xf32>
    %64 = vector.shape_cast %61 : vector<1x256xf32> to vector<1x1x256xf32>
    tpu.vector_store %arg6[%c0_19, %c0_20, %c0_21], %64 {strides = array<i32>} : memref<1x1x256xf32, #tpu.memory_space<vmem>>, vector<1x1x256xf32>,
    %c0_22 = arith.constant 0 : index
    %c0_23 = arith.constant 0 : index
    %c0_24 = arith.constant 0 : index
    %65 = vector.load %arg7[%c0_22, %c0_23, %c0_24] : memref<1x1x256xf32, #tpu.memory_space<vmem>>, vector<1x1x256xf32>
    %66 = vector.shape_cast %65 : vector<1x1x256xf32> to vector<1x256xf32>
    %67 = arith.extui %56 : vector<1x256xi1> to vector<1x256xi32>
    %68 = arith.sitofp %67 : vector<1x256xi32> to vector<1x256xf32>
    %69 = arith.addf %66, %68 : vector<1x256xf32>
    %c0_25 = arith.constant 0 : index
    %c0_26 = arith.constant 0 : index
    %c0_27 = arith.constant 0 : index
    %70 = vector.load %arg7[%c0_25, %c0_26, %c0_27] : memref<1x1x256xf32, #tpu.memory_space<vmem>>, vector<1x1x256xf32>
    %71 = vector.shape_cast %70 : vector<1x1x256xf32> to vector<1x256xf32>
    %72 = vector.shape_cast %69 : vector<1x256xf32> to vector<1x1x256xf32>
    tpu.vector_store %arg7[%c0_25, %c0_26, %c0_27], %72 {strides = array<i32>} : memref<1x1x256xf32, #tpu.memory_space<vmem>>, vector<1x1x256xf32>,
    return
  }
  func.func @transform_0(%arg0: i32, %arg1: i32, %arg2: i32, %arg3: memref<4xf32, #tpu.memory_space<smem>>) -> (i32, i32, i32) {
    %c1_i32 = arith.constant 1 : i32
    %0 = arith.muli %arg1, %c1_i32 : i32
    %1 = arith.addi %0, %arg2 : i32
    %c0_i32 = arith.constant 0 : i32
    %c0_i32_0 = arith.constant 0 : i32
    return %arg0, %c0_i32, %1 : i32, i32, i32
  }
  func.func @transform_1(%arg0: i32, %arg1: i32, %arg2: i32, %arg3: memref<4xf32, #tpu.memory_space<smem>>) -> (i32, i32, i32) {
    %c1_i32 = arith.constant 1 : i32
    %0 = arith.muli %arg1, %c1_i32 : i32
    %1 = arith.addi %0, %arg2 : i32
    %c0_i32 = arith.constant 0 : i32
    %c0_i32_0 = arith.constant 0 : i32
    return %arg0, %c0_i32, %1 : i32, i32, i32
  }
  func.func @transform_2(%arg0: i32, %arg1: i32, %arg2: i32, %arg3: memref<4xf32, #tpu.memory_space<smem>>) -> (i32, i32, i32) {
    %c1_i32 = arith.constant 1 : i32
    %0 = arith.muli %arg0, %c1_i32 : i32
    %1 = arith.addi %0, %arg1 : i32
    %c0_i32 = arith.constant 0 : i32
    %c0_i32_0 = arith.constant 0 : i32
    %c0_i32_1 = arith.constant 0 : i32
    return %1, %c0_i32, %c0_i32_0 : i32, i32, i32
  }
  func.func @transform_3(%arg0: i32, %arg1: i32, %arg2: i32, %arg3: memref<4xf32, #tpu.memory_space<smem>>) -> (i32, i32, i32) {
    %c1_i32 = arith.constant 1 : i32
    %0 = arith.muli %arg0, %c1_i32 : i32
    %1 = arith.addi %0, %arg1 : i32
    %c0_i32 = arith.constant 0 : i32
    %c0_i32_0 = arith.constant 0 : i32
    %c0_i32_1 = arith.constant 0 : i32
    return %1, %c0_i32, %c0_i32_0 : i32, i32, i32
  }
}

</mosaic_0001>

<bundles_post_ra>
// kernel: tpu_custom_call.1
= control target key start
LH: loop header
LB: loop body
LE: loop exit
PB: predicated region body
PF: predicated region fallthrough
CT: control target
= control target key end

     0   :  { %s933_s18 = smov [#allocation3]   ;;  %s1196_s0 = inlined_call_operand.hbm [shape: f32[4], index: 0, kind: input, shape index: {}]   ;;  %s1197_s1 = inlined_call_operand.hbm [shape: f32[2,4,256], index: 1, kind: input, shape index: {}]   ;;  %s1198_s2 = inlined_call_operand.hbm [shape: s32[2,1,256], index: 2, kind: input, shape index: {}]   ;;  %s1199_s3 = inlined_call_operand.hbm [shape: f32[2,1,256], index: 3, kind: output, shape index: {0}]   ;;  %s1200_s4 = inlined_call_operand.hbm [shape: f32[2,1,256], index: 4, kind: output, shape index: {1}]  }
   0x1   :  { %s11_s17 = sshll.u32 %s1196_s0, 4  ;;  %s12_s17 = int_to_ptr.hbm [resolvable:$true] %s11_s17 }
   0x2   :  { %14 = dma.hbm_to_smem %s12_s17, 16, %s933_s18, [#allocation2] }
   0x3   :  { %891 = dma.done.wait [#allocation2], 16 }
   0x4   :  { %892 = vsyncadd [#allocation2], 4294967280 }
   0x5   :  { %17 = sfence }
   0x6   :  { %18 = vsyncpa [#allocation5], 0 }
   0x7   :  { %20 = vsyncpa [#allocation5 + $0x1], 0 }
   0x8   :  { %21 = vsyncpa [#allocation8], 0 }
   0x9   :  { %23 = vsyncpa [#allocation8 + $0x1], 0 }
   0xa   :  { %24 = vsyncpa [#allocation6], 0 }
   0xb   :  { %26 = vsyncpa [#allocation6 + $0x1], 0 }
   0xc   :  { %27 = vsyncpa [#allocation11], 0 }
   0xd   :  { %29 = vsyncpa [#allocation11 + $0x1], 0  ;;  %s963_s19 = smov 0   ;;  %s965_s20 = smov 0  }
   0xe   :  { %s967_s21 = smov 0   ;;  %s969_s0 = smov 0  }
   0xf   :  { %s971_s22 = smov 0   ;;  %s973_s23 = smov 0  }
  0x10 LB: > { %s630_s24 = sadd.s32 4294967295, %s931_s23   ;;  %s631_s25 = sadd.s32 4294967294, %s931_s23   ;;  %s931_s23 = sphi %s973_s23, %s35_s23   ;;  %s927_s22 = sphi %s971_s22, %s1212_s22   ;;  %s923_s0 = sphi %s969_s0, %s1211_s0   ;;  %s919_s21 = sphi %s967_s21, %s1210_s21   ;;  %s915_s20 = sphi %s965_s20, %s1209_s20   ;;  %s911_s19 = sphi %s963_s19, %s1208_s19  }
  0x11   : > { %s54_s26 = sadd.s32 1, %s927_s22  ;;  %s65_s27 = sadd.s32 1, %s919_s21 }
  0x12   : > { %p56_p0 = scmp.ge.s32.totalorder %s54_s26, 2  ;;  %p72_p1 = scmp.ne.s32.totalorder %s919_s21, %s915_s20 }
  0x13   : > { %p73_p2 = scmp.eq.s32.totalorder %s931_s23, 0  ;;  %p78_p3 = scmp.ne.s32.totalorder %s915_s20, %s911_s19 }
  0x14   : > { %s1214_s26 = smov (%p56_p0, %s54_s26), 0  ;;  %p79_p5 = scmp.eq.s32.totalorder %s630_s24, 0 }
  0x15   : > { %p1004_p4 = por %p73_p2, %p72_p1  ;;  %s60_s29 = ssub.s32 %s927_s22, %s1214_s26 }
  0x16   : > { %p134_p6 = scmp.eq.s32.totalorder %s630_s24, 1  ;;  %p63_p7 = scmp.eq.s32.totalorder %s60_s29, 0 }
  0x17   : > { %p1010_p8 = por %p79_p5, %p78_p3  ;;  %p140_p10 = scmp.eq.s32.totalorder %s631_s25, 1 }
  0x18   : > { %p1014_p9 = por %p134_p6, %p72_p1  ;;  %p633_p12 = scmp.ge.s32.totalorder %s931_s23, 2 }
  0x19   : > { %s1019_s6 = scalar_select %p63_p7, %s919_s21, %s65_s27  }
  0x1a   : > { %p1021_p11 = por %p140_p10, %p78_p3  ;;  %p677_p13 = scmp.lt.s32.totalorder %s931_s23, 2 }
  0x1b   : > { %s188_s8 = sand.u32 1, %s919_s21   ;;  %s654_s10 = sshll.u32 %s927_s22, 3 }
  0x1c   : > { %s634_s9 = sshll.u32 %s188_s8, 3  ;;  %s200_s13 = scalar_lea.hbm %s1197_s1, %s654_s10 }
  0x1d   : > { %s192_s14 = scalar_lea.vmem [#allocation4], %s634_s9  ;;  %s202_s16 = sshll.u32 %s200_s13, 4  ;;  %s203_s16 = int_to_ptr.hbm [resolvable:$true] %s202_s16 }
  0x1e   : > { %s204_s15 = sshll.u32 %s192_s14, 4  ;;  %p1034_p0 = pnand %p677_p13, %p1004_p4  ;;  %s205_s15 = int_to_ptr.vmem [resolvable:$true] %s204_s15 }
  0x1f   : > { %p639_p1 = scmp.ge.s32.totalorder %s931_s23, 1  ;;  %p231_p2 = scmp.lt.s32.totalorder %s931_s23, 3 }
  0x20   : > { %s189_s18 = scalar_lea.sflag [#allocation5], %s188_s8  ;;  %s637_s24 = sshll.u32 %s188_s8, 1 }
  0x21   : > { %666 = dma.hbm_to_vmem [thread:$0]  (!%p1034_p0), %s203_s16, 128, %s205_s15, %s189_s18  }
  0x22   : > { %p232_p3 = pnand %p639_p1, %p231_p2  ;;  %s638_s25 = sshll.u32 %s927_s22, 1 }
  0x23   : > { %s222_s9 = scalar_lea.hbm %s1198_s2, %s638_s25  ;;  %s215_s10 = scalar_lea.vmem [#allocation7], %s637_s24 }
  0x24   : > { %s226_s28 = sshll.u32 %s215_s10, 4  ;;  %s224_s11 = sshll.u32 %s222_s9, 4  ;;  %s227_s28 = int_to_ptr.vmem [resolvable:$true] %s226_s28  ;;  %s225_s11 = int_to_ptr.hbm [resolvable:$true] %s224_s11 }
  0x25   : > { %s212_s12 = scalar_lea.sflag [#allocation8], %s188_s8  ;;  %235 = sbr.rel (%p232_p3) target bundleno = 144 (0x90), region = 28 }
  0x26   : > { %669 = dma.hbm_to_vmem [thread:$0]  (!%p1034_p0), %s225_s11, 32, %s227_s28, %s212_s12  }
  0x27   : > { %s1049_s13 = sand.u32 (!%p232_p3), 1, %s915_s20  }
  0x28   : > { %s640_s14 = sshll.u32 (!%p232_p3), %s1049_s13, 3  ;;  %s238_s15 = scalar_lea.sflag (!%p232_p3), [#allocation5], %s1049_s13 }
  0x29   : > { %s241_s16 = scalar_lea.vmem (!%p232_p3), [#allocation4], %s640_s14 }
  0x2a   : > { %894 = dma.done.wait (%p1010_p8), %s238_s15, 128  }
  0x2b   : > { %896 = vsyncadd (%p1010_p8), %s238_s15, 4294967168  ;;  %s1058_s8 = sshll.u32 %s1049_s13, 1  ;;  %s248_s17 = scalar_lea.sflag [#allocation8], %s1049_s13 }
  0x2c   : > { %s251_s18 = scalar_lea.vmem [#allocation7], %s1058_s8 }
  0x2d   : > { %898 = dma.done.wait (%p1010_p8), %s248_s17, 32  }
  0x2e   : > { %900 = vsyncadd (%p1010_p8), %s248_s17, 4294967264  ;;  %v301_v0 = vld [vmem:[%s241_s16] sm:$0xff]  ;;  %vm309_vm0 = vcmask 1043456   ;;  %v295_v21 = vlaneseq  ;;  %s1080_s30 = scalar_lea.vmem [#allocation9], %s1058_s8  ;;  %v934_v23 = vmov 0.0   ;;  %s1086_s24 = scalar_lea.vmem [#allocation10], %s1058_s8 }
  0x2f   : > { %304 = vst [vmem:[#allocation1] ss:$2 sm:$0xff] %v301_v0  ;;  %v1093_v25 = vld [vmem:[%s251_s18] sm:$0x3]  ;;  %s650_s25 = sshll.u32 %s923_s0, 1  ;;  %s1102_s27 = sld [smem:[#allocation3]] }
  0x30   : > { %vm1075_vm1 = vcmp.lt.s32.totalorder %v295_v21, 256  ;;  %v357_v30 = vshrl.u32 %v295_v21, 7  ;;  %v358_v33 = vperm.slane %v1093_v25, 0  ;;  %v359_v34 = vperm.slane %v1093_v25, 1  ;;  %s479_s10 = scalar_lea.hbm %s1200_s4, %s650_s25  ;;  %s1109_s28 = sld [smem:[#allocation3 + $0x1]] }
  0x31   : > { %299 = vst.msk [vmem:[%s1080_s30] sm:$0x3] %vm1075_vm1, %v934_v23  ;;  %vm428_vm4 = vcmp.ne.s32.totalorder %v1093_v25, 4294967196  ;;  %s481_s11 = sshll.u32 %s1086_s24, 4  ;;  %s483_s12 = sshll.u32 %s479_s10, 4  ;;  %vm387_vm5 = vcmp.eq.s32.totalorder %v1093_v25, 0  ;;  %s482_s11 = int_to_ptr.vmem [resolvable:$true] %s481_s11  ;;  %s484_s12 = int_to_ptr.hbm [resolvable:$true] %s483_s12 }
  0x32   : > { %300 = vst.msk [vmem:[%s1086_s24] sm:$0x3] %vm1075_vm1, %v934_v23  ;;  %vm360_vm2 = vcmp.eq.s32.totalorder %v357_v30, %v358_v33  ;;  %vm361_vm3 = vcmp.eq.s32.totalorder %v357_v30, %v359_v34  ;;  %s1113_s14 = sld [smem:[#allocation3 + $0x2]]  ;;  %v647_v57 = vsel %vm428_vm4, 1.0, %v934_v23  ;;  %vm391_vm6 = vcmp.eq.s32.totalorder %v1093_v25, 1  ;;  %s453_s16 = scalar_lea.sflag [#allocation11], %s1049_s13 }
  0x33   : > { %s1120_s15 = sld [smem:[#allocation3 + $0x3]]  ;;  %s825_s8 = sshra.s32 %s484_s12, 4  ;;  %s826_s8 = int_to_ptr.hbm [resolvable:$true] %s825_s8 }
  0x34   : > { %s827_s17 = scalar_lea.hbm %s826_s8, 2  ;;  %s831_s29 = scalar_lea.hbm %s1200_s4, 4 }
  0x35   : > { %v389_v62 = vstv %s1102_s27  ;;  %p828_p4 = scmp.ne.s32.totalorder %s826_s8, %s827_s17  ;;  %p832_p7 = scmp.lt.s32.totalorder %s826_s8, %s1200_s4 }
  0x36   : > { %v305_v1 = vld.sshfl [vmem:[#allocation1] sm:$0xff pattern:$0x75316420]  ;;  %v306_v2 = vld.sshfl [vmem:[#allocation1 + $0x8] sm:$0xff pattern:$0x75316420]  ;;  %p833_p8 = scmp.lt.s32.totalorder %s831_s29, %s827_s17 }
  0x37   : > { %v310_v3 = vsel %vm309_vm0, %v305_v1, -inf  ;;  %v317_v4 = vsel %vm309_vm0, %v306_v2, -inf  ;;  %p829_p5 = pnand %p828_p4, %p1014_p9 }
  0x38   : > { %v311_v5 = vrot.slane %v310_v3, 4  ;;  %v318_v6 = vrot.slane %v317_v4, 4  ;;  %p834_p10 = por %p833_p8, %p832_p7 }
  0x39   : > { %v442_v58 = vld [vmem:[%s1086_s24] sm:$0x3]  ;;  %p830_p6 = pneg %p829_p5 }
  0x3a   : > { %v312_v7 = vmax.f32 %v310_v3, %v311_v5  ;;  %v319_v8 = vmax.f32 %v317_v4, %v318_v6  ;;  %v445_v61 = vadd.f32 %v647_v57, %v442_v58 }
  0x3b   : > { %p835_p13 = pnand %p834_p10, %p830_p6 }
  0x3c   : > { %v313_v9 = vrot.slane %v312_v7, 2  ;;  %v320_v10 = vrot.slane %v319_v8, 2  ;;  %446 = vst.msk [vmem:[%s1086_s24] sm:$0x3] %vm1075_vm1, %v445_v61 }
  0x3e   : > { %v314_v11 = vmax.f32 %v312_v7, %v313_v9  ;;  %v321_v12 = vmax.f32 %v319_v8, %v320_v10 }
  0x40   : > { %v315_v13 = vrot.slane %v314_v11, 1  ;;  %v322_v14 = vrot.slane %v321_v12, 1 }
  0x42   : > { %v1068_v15 = vmax.f32 %v321_v12, %v322_v14  ;;  %v1070_v16 = vmax.f32 %v314_v11, %v315_v13 }
  0x44   : > { %v326_v17 = vrot.slane %v1068_v15, 4 }
  0x46   : > { %v327_v18 = vsel %vm309_vm0, %v1070_v16, %v326_v17 }
  0x47   : > { %v329_v19 = vsub.f32 %v301_v0, %v327_v18 }
  0x49   : > { %v330_v20 = vmul.f32 1.442695, %v329_v19 }
  0x4b   : > { %729 = vpow2.f32 %v330_v20 }
  0x51   : > { %v730_v24 = vpop.eup %729 }
  0x52   : > { %333 = vst [vmem:[#allocation1] ss:$2 sm:$0xff] %v730_v24 }
  0x59   : > { %v334_v26 = vld.sshfl [vmem:[#allocation1] sm:$0xff pattern:$0x75316420]  ;;  %v335_v27 = vld.sshfl [vmem:[#allocation1 + $0x8] sm:$0xff pattern:$0x75316420] }
  0x5a   : > { %v338_v28 = vsel %vm309_vm0, %v334_v26, 0.0  ;;  %v345_v29 = vsel %vm309_vm0, %v335_v27, 0.0  ;;  %362 = vst [vmem:[#allocation1] ss:$2 sm:$0xff] %v301_v0 }
  0x5b   : > { %v339_v31 = vrot.slane %v338_v28, 4  ;;  %v346_v32 = vrot.slane %v345_v29, 4 }
  0x5d   : > { %v340_v35 = vadd.f32 %v339_v31, %v338_v28  ;;  %v347_v36 = vadd.f32 %v346_v32, %v345_v29 }
  0x5f   : > { %v341_v37 = vrot.slane %v340_v35, 2  ;;  %v348_v38 = vrot.slane %v347_v36, 2 }
  0x61   : > { %v342_v39 = vadd.f32 %v341_v37, %v340_v35  ;;  %v349_v40 = vadd.f32 %v348_v38, %v347_v36  ;;  %v363_v41 = vld.sshfl [vmem:[#allocation1] sm:$0xff pattern:$0x75316420]  ;;  %v364_v42 = vld.sshfl [vmem:[#allocation1 + $0x8] sm:$0xff pattern:$0x75316420] }
  0x62   : > { %v367_v43 = vsel %vm360_vm2, %v363_v41, 0.0  ;;  %v368_v44 = vsel %vm361_vm3, %v364_v42, 0.0 }
  0x63   : > { %v343_v45 = vrot.slane %v342_v39, 1  ;;  %v350_v46 = vrot.slane %v349_v40, 1  ;;  %v369_v47 = vsel %vm309_vm0, %v367_v43, 0.0  ;;  %v376_v48 = vsel %vm309_vm0, %v368_v44, 0.0 }
  0x64   : > { %v370_v49 = vrot.slane %v369_v47, 4  ;;  %v377_v50 = vrot.slane %v376_v48, 4 }
  0x65   : > { %v344_v51 = vadd.f32 %v343_v45, %v342_v39  ;;  %v351_v52 = vadd.f32 %v350_v46, %v349_v40 }
  0x66   : > { %v371_v53 = vadd.f32 %v370_v49, %v369_v47  ;;  %v378_v54 = vadd.f32 %v377_v50, %v376_v48 }
  0x67   : > { %731 = vlog2.f32 %v344_v51 }
  0x68   : > { %733 = vlog2.f32 %v351_v52  ;;  %v372_v55 = vrot.slane %v371_v53, 2  ;;  %v379_v56 = vrot.slane %v378_v54, 2 }
  0x6a   : > { %v373_v59 = vadd.f32 %v372_v55, %v371_v53  ;;  %v380_v60 = vadd.f32 %v379_v56, %v378_v54 }
  0x6c   : > { %v374_v63 = vrot.slane %v373_v59, 1  ;;  %v381_v0 = vrot.slane %v380_v60, 1 }
  0x6d   : > { %v732_v1 = vpop.eup %731 }
  0x6e   : > { %838 = shalt.err (!%p835_p13)
}
  0x6f   : > { %660 = dma.vmem_to_hbm [thread:$0]  (%p1014_p9), %s482_s11, 32, %s484_s12, %s453_s16   ;;  %v734_v2 = vpop.eup %733  ;;  %v375_v3 = vadd.f32 %v374_v63, %v373_v59  ;;  %v382_v4 = vadd.f32 %v381_v0, %v380_v60  ;;  %v390_v5 = vsel %vm387_vm5, %v389_v62, 0.0  ;;  %v393_v6 = vstv %s1109_s28  ;;  %v429_v39 = vld [vmem:[%s1080_s30] sm:$0x3] }
  0x70   : > { %v355_v7 = vmul.f32 0.6931472, %v734_v2  ;;  %v353_v8 = vmul.f32 0.6931472, %v732_v1  ;;  %v394_v11 = vsel %vm391_vm6, %v393_v6, %v390_v5  ;;  %vm395_vm7 = vcmp.eq.s32.totalorder %v1093_v25, 2  ;;  %s464_s11 = scalar_lea.hbm %s1199_s3, %s650_s25  ;;  %s466_s12 = sshll.u32 %s1080_s30, 4  ;;  %s467_s12 = int_to_ptr.vmem [resolvable:$true] %s466_s12 }
  0x71   : > { %v383_v9 = vsub.f32 %v375_v3, %v1070_v16  ;;  %v384_v10 = vsub.f32 %v382_v4, %v1068_v15  ;;  %v397_v12 = vstv %s1113_s14  ;;  %vm399_vm8 = vcmp.eq.s32.totalorder %v1093_v25, 3  ;;  %s468_s14 = sshll.u32 %s464_s11, 4  ;;  %s448_s0 = scalar_lea.sflag [#allocation6], %s1049_s13  ;;  %s469_s14 = int_to_ptr.hbm [resolvable:$true] %s468_s14 }
  0x72   : > { %v401_v17 = vstv %s1120_s15  ;;  %vm406_vm9 = vcmask 1040384   ;;  %v398_v18 = vsel %vm395_vm7, %v397_v12, %v394_v11  ;;  %s853_s15 = sshra.s32 %s469_s14, 4  ;;  %s859_s17 = scalar_lea.hbm %s1199_s3, 4  ;;  %s854_s15 = int_to_ptr.hbm [resolvable:$true] %s853_s15 }
  0x73   : > { %v385_v13 = vsub.f32 %v383_v9, %v353_v8  ;;  %v386_v14 = vsub.f32 %v384_v10, %v355_v7  ;;  %v402_v16 = vsel %vm399_vm8, %v401_v17, %v398_v18  ;;  %s855_s25 = scalar_lea.hbm %s854_s15, 2  ;;  %p860_p3 = scmp.lt.s32.totalorder %s854_s15, %s1199_s3 }
  0x74   : > { %p856_p0 = scmp.ne.s32.totalorder %s854_s15, %s855_s25  ;;  %p861_p4 = scmp.lt.s32.totalorder %s859_s17, %s855_s25 }
  0x75   : > { %v405_v19 = vrot.slane %v386_v14, 7  ;;  %v411_v20 = vmul.f32 1.442695, %v385_v13  ;;  %v413_v21 = vmul.f32 1.442695, %v386_v14 }
  0x76   : > { %p857_p1 = pnand %p856_p0, %p1014_p9  ;;  %p862_p5 = por %p861_p4, %p860_p3 }
  0x77   : > { %735 = vpow2.f32 %v411_v20  ;;  %v407_v15 = vsel %vm406_vm9, %v385_v13, %v405_v19 }
  0x78   : > { %737 = vpow2.f32 %v413_v21  ;;  %v409_v23 = vmul.f32 %v407_v15, %v402_v16  ;;  %p858_p2 = pneg %p857_p1 }
  0x7a   : > { %v410_v28 = vsub.f32 0.0, %v409_v23  ;;  %p863_p6 = pnand %p862_p5, %p858_p2 }
  0x7c   : > { %v423_v34 = vperm.slane %v410_v28, 1  ;;  %v422_v35 = vperm.slane %v410_v28, 0 }
  0x7d   : > { %v736_v24 = vpop.eup %735 }
  0x7e   : > { %v738_v26 = vpop.eup %737  ;;  %v415_v27 = vsub.f32 1.0, %v736_v24 }
  0x7f   : > { %v416_v29 = vsub.f32 1.0, %v738_v26 }
  0x80   : > { %v417_v30 = vmax.f32 %v415_v27, 0.0 }
  0x81   : > { %v418_v31 = vmax.f32 %v416_v29, 0.0 }
  0x82   : > { %v419_v32 = vmul.f32 %v417_v30, %v417_v30 }
  0x83   : > { %v420_v33 = vmul.f32 %v418_v31, %v418_v31 }
  0x84   : > { %v426_v37 = vmul.f32 %v422_v35, %v419_v32 }
  0x85   : > { %v427_v36 = vmul.f32 %v423_v34, %v420_v33 }
  0x87   : > { %v432_v38 = vrot.slane %v427_v36, 7 }
  0x89   : > { %v433_v40 = vsel %vm406_vm9, %v426_v37, %v432_v38 }
  0x8a   : > { %v435_v41 = vsel %vm428_vm4, %v433_v40, 0.0 }
  0x8b   : > { %v436_v42 = vadd.f32 %v435_v41, %v429_v39 }
  0x8d   : > { %441 = vst.msk [vmem:[%s1080_s30] sm:$0x3] %vm1075_vm1, %v436_v42 }
  0x8e   : > { %866 = shalt.err (!%p863_p6)
}
  0x8f   : > { %659 = dma.vmem_to_hbm [thread:$0]  (%p1014_p9), %s467_s12, 32, %s469_s14, %s448_s0  }
  0x90 PF: > { %s495_s13 = sand.u32 1, %s911_s19   ;;  %p671_p7 = pnand %p633_p12, %p1021_p11 }
  0x91   : > { %s496_s30 = scalar_lea.sflag [#allocation6], %s495_s13 }
  0x92   : > { %p672_p8 = pneg %p671_p7 }
  0x94   : > { %902 = dma.done.wait (%p672_p8), %s496_s30, 32  }
  0x95   : > { %904 = vsyncadd (%p672_p8), %s496_s30, 4294967264  ;;  %s506_s29 = scalar_lea.sflag [#allocation11], %s495_s13 }
  0x96   : > { %906 = dma.done.wait (%p672_p8), %s506_s29, 32  }
  0x97   : > { %908 = vsyncadd (%p672_p8), %s506_s29, 4294967264  ;;  %s35_s23 = sadd.s32 1, %s931_s23   ;;  %s1208_s19 = smov %s915_s20 }
  0x98   : > { %p32_p10 = scmp.ge.s32.totalorder %s35_s23, 4   ;;  %s1209_s20 = smov %s919_s21 }
  0x99   : > { %s1210_s21 = smov %s1019_s6  ;;  %s1211_s0 = smov %s927_s22 }
  0x9a   : > { %s1212_s22 = smov %s1214_s26  ;;  %34 = sbr.rel (!%p32_p10) target bundleno = 16 (0x10), region = 107 }
  0x9f   :  { %512 = vsyncpa [#allocation5], 1 }
  0xa0   :  { %514 = vsyncpa [#allocation5 + $0x1], 1 }
  0xa1   :  { %515 = vsyncpa [#allocation8], 1 }
  0xa2   :  { %517 = vsyncpa [#allocation8 + $0x1], 1 }
  0xa3   :  { %518 = vsyncpa [#allocation6], 1 }
  0xa4   :  { %520 = vsyncpa [#allocation6 + $0x1], 1 }
  0xa5   :  { %521 = vsyncpa [#allocation11], 1 }
  0xa6   :  { %523 = vsyncpa [#allocation11 + $0x1], 1 }

</bundles_post_ra>
